<compile_context>
chip_gen: v7x
topology: tpu7x:2x2x1
jax: 0.10.0
libtpu: 0.0.40
codegen_flags: <defaults>
</compile_context>

<pallas_src>
import functools

import jax
import jax.numpy as jnp
from jax.experimental import pallas as pl
from jax.experimental.pallas import tpu as pltpu


_VMEM_LIMIT_BYTES = 32 * 1024 * 1024   # <= 25% of v5e/v6e VMEM, 50% of v7x's 64 MiB
_VMEM_PLAN_BUDGET = 24 * 1024 * 1024   # planning headroom under the scoped limit
_MAX_TM = 256
_MAX_TK = 1024
_MAX_TN = 1024


def _round_up(x, m):
    return ((x + m - 1) // m) * m


def _largest_dividing_tile(dim, cap, min_blocks=1):
    """Largest multiple of 128 (<= cap) dividing round_up(dim, 128).

    min_blocks > 1 additionally caps the tile so the padded axis has at least
    that many blocks (used to keep >= 2 blocks on the parallel D axis for
    multi-TensorCore chips).
    """
    padded = _round_up(max(dim, 1), 128)
    units = padded // 128
    cap_units = max(cap // 128, 1)
    if min_blocks > 1 and units >= min_blocks:
        cap_units = min(cap_units, units // min_blocks)
    cap_units = min(cap_units, units)
    best = 1
    for d in range(1, cap_units + 1):
        if units % d == 0:
            best = d
    return best * 128, padded


def _on_multi_core_chip():
    """True on chips with >1 TensorCore sharing the grid (v7x)."""
    try:
        kind = jax.devices()[0].device_kind.lower()
    except Exception:
        return False
    return "v7" in kind


def _plan_tiles(A, N, D, in_itemsize, prefer_two_j_blocks):
    """Tile sizes + padded shapes + whether P can stay whole-K VMEM-resident."""
    tm_align = 16 if in_itemsize == 2 else 8   # bf16 sublane packing needs 16
    A_pad = _round_up(A, tm_align)
    if A_pad <= _MAX_TM:
        tm = A_pad
    else:
        tm = _MAX_TM
        A_pad = _round_up(A, tm)

    tk, N_pad = _largest_dividing_tile(N, _MAX_TK)
    min_j = 2 if (prefer_two_j_blocks and _round_up(D, 128) >= 256) else 1
    tn, D_pad = _largest_dividing_tile(D, _MAX_TN, min_blocks=min_j)

    # Double-buffered VMEM footprint (bytes): X stream, f32 output block,
    # and the candidate whole-K-resident P copy.
    x_bytes = 2 * tk * tn * in_itemsize
    o_bytes = 2 * tm * tn * 4
    p_resident_bytes = 2 * tm * N_pad * in_itemsize
    p_resident = (x_bytes + o_bytes + p_resident_bytes) <= _VMEM_PLAN_BUDGET
    return tm, tk, tn, A_pad, N_pad, D_pad, p_resident


def _anchor_kernel_resident_p(p_ref, x_ref, o_ref):
    """One (i, j, k) step with whole-K-resident P: o[i,j] += P[k-th chunk] @ X[k,j].

    p_ref block is (K_blocks, tm, tk) with a constant block index, so Pallas
    DMAs it once per row-block; p_ref[k] is just an address offset.
    The output block index ignores k, so o_ref is the accumulator.
    """
    k = pl.program_id(2)

    @pl.when(k == 0)
    def _():
        o_ref[...] = jnp.zeros_like(o_ref)

    o_ref[...] += jnp.dot(
        p_ref[k], x_ref[...], preferred_element_type=jnp.float32
    ).astype(o_ref.dtype)


def _anchor_kernel_streamed_p(p_ref, x_ref, o_ref):
    """Fallback when resident P would not fit VMEM: stream (tm, tk) P tiles."""
    @pl.when(pl.program_id(2) == 0)
    def _():
        o_ref[...] = jnp.zeros_like(o_ref)

    o_ref[...] += jnp.dot(
        p_ref[...], x_ref[...], preferred_element_type=jnp.float32
    ).astype(o_ref.dtype)


@functools.partial(
    jax.jit,
    static_argnames=("allow_xla_fastpath", "use_bf16_inputs", "force_stream_p"),
)
def anchor_selector_forward(P, X, *, allow_xla_fastpath=True,
                            use_bf16_inputs=False, force_stream_p=False):
    """anchors = P @ X via a tiled Pallas TPU matmul.

    P: [N_anchors, N], X: [N, D]  ->  anchors: [N_anchors, D] (f32).
    Padding (when needed) contributes exact zeros to the contraction.
    """
    A, N = P.shape
    N2, D = X.shape
    assert N == N2, "contraction dims must match"
    out_dtype = jnp.float32  # matches torch: f32 parameter @ f32 embeddings

    if use_bf16_inputs:
        # Pure bandwidth win on the memory-bound X stream; accumulation is f32.
        Pc = P.astype(jnp.bfloat16)
        Xc = X.astype(jnp.bfloat16)
    else:
        Pc, Xc = P, X
    in_itemsize = jnp.dtype(Pc.dtype).itemsize

    tm, tk, tn, A_pad, N_pad, D_pad, p_resident = _plan_tiles(
        A, N, D, in_itemsize, prefer_two_j_blocks=_on_multi_core_chip()
    )
    if force_stream_p:
        p_resident = False
    grid = (A_pad // tm, D_pad // tn, N_pad // tk)

    # Fast path: single-tile problems are dominated by pallas_call fixed cost
    # and padding work; XLA's fused dot (same default MXU precision, f32 acc)
    # is strictly better there.
    if allow_xla_fastpath and grid == (1, 1, 1):
        return jnp.dot(Pc, Xc, preferred_element_type=out_dtype).astype(out_dtype)

    # Pad only when the shapes don't already divide the tiles. P is small, so
    # padding it is cheap; avoiding an X pad removes a full extra HBM
    # read+write of the memory-bound operand.
    if (A_pad, N_pad) == (A, N):
        P_p = Pc
    else:
        P_p = jnp.zeros((A_pad, N_pad), Pc.dtype).at[:A, :N].set(Pc)
    if (N_pad, D_pad) == (N, D):
        X_p = Xc
    else:
        X_p = jnp.zeros((N_pad, D_pad), Xc.dtype).at[:N, :D].set(Xc)

    k_blocks = N_pad // tk

    cost = pl.CostEstimate(
        flops=2 * A_pad * N_pad * D_pad,
        bytes_accessed=(in_itemsize * (A_pad * N_pad + N_pad * D_pad)
                        + 4 * A_pad * D_pad),
        transcendentals=0,
    )
    compiler_params = pltpu.CompilerParams(
        # K (reduction) stays innermost + "arbitrary"; i and j are "parallel"
        # so the D axis can shard across v7x's two TensorCores.
        dimension_semantics=("parallel", "parallel", "arbitrary"),
        vmem_limit_bytes=_VMEM_LIMIT_BYTES,
    )

    x_spec = pl.BlockSpec((tk, tn), lambda i, j, k: (k, j))        # streamed operand
    out_spec = pl.BlockSpec((tm, tn), lambda i, j, k: (i, j))       # lane-dense output

    if p_resident:
        # (K_blocks, A_pad, tk): constant block index -> single DMA of the
        # whole P row-block; only X streams from HBM afterwards.
        P_r = P_p.reshape(A_pad, k_blocks, tk).transpose(1, 0, 2)
        kernel = _anchor_kernel_resident_p
        p_spec = pl.BlockSpec((k_blocks, tm, tk), lambda i, j, k: (0, i, 0))
        p_arg = P_r
    else:
        kernel = _anchor_kernel_streamed_p
        p_spec = pl.BlockSpec((tm, tk), lambda i, j, k: (i, k))
        p_arg = P_p

    out_padded = pl.pallas_call(
        kernel,
        out_shape=jax.ShapeDtypeStruct((A_pad, D_pad), out_dtype),
        grid_spec=pltpu.PrefetchScalarGridSpec(
            num_scalar_prefetch=0,
            grid=grid,
            in_specs=[p_spec, x_spec],
            out_specs=out_spec,
        ),
        compiler_params=compiler_params,
        cost_estimate=cost,
    )(p_arg, X_p)

    if (A_pad, D_pad) == (A, D):
        return out_padded
    return out_padded[:A, :D]


def init_anchor_selector_params(key, N, N_anchors, dtype=jnp.float32):
    """Deterministic stand-in for nn.Parameter(torch.randn(N_anchors, N))."""
    return jax.random.normal(key, (N_anchors, N), dtype=dtype)


def _reference(P, X):
    # Test-only ground truth (highest precision); the forward path itself uses
    # one consistent (default MXU) precision policy on both branches.
    return jnp.dot(P, X, precision=jax.lax.Precision.HIGHEST)


if __name__ == "__main__":
    key = jax.random.PRNGKey(0)
    keys = jax.random.split(key, 6)

    # --- Case 1: tiny shapes consistent with the module (N=16 embeddings,
    #     D=32 dims, 8 anchors). Exercise both the Pallas path and fast path.
    N, D, A = 16, 32, 8
    P_s = init_anchor_selector_params(keys[0], N, A)
    X_s = jax.random.normal(keys[1], (N, D), dtype=jnp.float32)
    ref_s = _reference(P_s, X_s)

    out_pallas_s = jax.block_until_ready(
        anchor_selector_forward(P_s, X_s, allow_xla_fastpath=False)
    )
    out_fast_s = jax.block_until_ready(anchor_selector_forward(P_s, X_s))
    assert out_pallas_s.shape == (A, D)
    assert jnp.allclose(out_pallas_s, ref_s, rtol=2e-3, atol=2e-2)
    assert jnp.allclose(out_fast_s, ref_s, rtol=2e-3, atol=2e-2)

    # --- Case 2: multi-block grid (K_blocks=3, >=2 j blocks), resident-P path.
    N, D, A = 2304, 1536, 16
    P_m = init_anchor_selector_params(keys[2], N, A)
    X_m = jax.random.normal(keys[3], (N, D), dtype=jnp.float32)
    ref_m = _reference(P_m, X_m)

    out_m = jax.block_until_ready(
        anchor_selector_forward(P_m, X_m, allow_xla_fastpath=False)
    )
    assert out_m.shape == (A, D)
    assert jnp.allclose(out_m, ref_m, rtol=2e-3, atol=5e-2)

    # --- Case 2b: forced streamed-P fallback kernel on the same shapes.
    out_m_stream = jax.block_until_ready(
        anchor_selector_forward(P_m, X_m, allow_xla_fastpath=False,
                                force_stream_p=True)
    )
    assert jnp.allclose(out_m_stream, ref_m, rtol=2e-3, atol=5e-2)

    # --- Case 3: awkward, non-aligned shapes -> padding-aware tiles
    #     (tk=1024, tn=640 on single-TC chips; only ~2.4% K padding).
    N, D, A = 1000, 640, 20
    P_o = init_anchor_selector_params(keys[4], N, A)
    X_o = jax.random.normal(keys[5], (N, D), dtype=jnp.float32)
    ref_o = _reference(P_o, X_o)

    out_o = jax.block_until_ready(
        anchor_selector_forward(P_o, X_o, allow_xla_fastpath=False)
    )
    assert out_o.shape == (A, D)
    assert jnp.allclose(out_o, ref_o, rtol=2e-3, atol=2e-2)

    # --- Case 4: bf16-input bandwidth mode (f32 accumulation), checked against
    #     a bf16-input / f32-accumulation XLA reference.
    ref_o_bf16 = jnp.dot(P_o.astype(jnp.bfloat16), X_o.astype(jnp.bfloat16),
                         preferred_element_type=jnp.float32)
    out_o_bf16 = jax.block_until_ready(
        anchor_selector_forward(P_o, X_o, allow_xla_fastpath=False,
                                use_bf16_inputs=True)
    )
    assert out_o_bf16.shape == (A, D)
    assert out_o_bf16.dtype == jnp.float32
    assert jnp.allclose(out_o_bf16, ref_o_bf16, rtol=1e-2, atol=5e-2)

    print("KERNEL_OK")
</pallas_src>

<mosaic_0001>
module attributes {stable_mosaic.version = 11 : i64} {
  func.func @_anchor_kernel_resident_p(%arg0: i32, %arg1: i32, %arg2: i32, %arg3: memref<1x8x128xf32, #tpu.memory_space<vmem>>, %arg4: memref<128x128xf32, #tpu.memory_space<vmem>>, %arg5: memref<8x128xf32, #tpu.memory_space<vmem>>) attributes {dimension_semantics = [#tpu.dimension_semantics<parallel>, #tpu.dimension_semantics<parallel>, #tpu.dimension_semantics<arbitrary>], iteration_bounds = array<i64: 1, 1, 1>, scalar_prefetch = 0 : i64, scratch_operands = 0 : i64, tpu.core_type = #tpu.core_type<tc>, window_params = [{transform_indices = @transform_0, window_bounds = array<i64: 1, 8, 128>}, {transform_indices = @transform_1, window_bounds = array<i64: 128, 128>}, {transform_indices = @transform_2, window_bounds = array<i64: 8, 128>}]} {
    %c0_i32 = arith.constant 0 : i32
    %0 = arith.cmpi eq, %arg2, %c0_i32 : i32
    %1 = arith.extui %0 : i1 to i32
    %c0_i32_0 = arith.constant 0 : i32
    %2 = arith.cmpi ne, %1, %c0_i32_0 : i32
    scf.if %2 {
      %cst_8 = arith.constant 0.000000e+00 : f32
      %11 = vector.broadcast %cst_8 : f32 to vector<8x128xf32>
      %c0_9 = arith.constant 0 : index
      %c0_10 = arith.constant 0 : index
      %12 = vector.load %arg5[%c0_9, %c0_10] : memref<8x128xf32, #tpu.memory_space<vmem>>, vector<8x128xf32>
      tpu.vector_store %arg5[%c0_9, %c0_10], %11 {strides = array<i32>} : memref<8x128xf32, #tpu.memory_space<vmem>>, vector<8x128xf32>,
    } else {
    }
    %c0 = arith.constant 0 : index
    %c0_1 = arith.constant 0 : index
    %3 = vector.load %arg5[%c0, %c0_1] : memref<8x128xf32, #tpu.memory_space<vmem>>, vector<8x128xf32>
    %4 = arith.index_cast %arg2 : i32 to index
    %c0_2 = arith.constant 0 : index
    %c0_3 = arith.constant 0 : index
    %5 = vector.load %arg3[%4, %c0_2, %c0_3] : memref<1x8x128xf32, #tpu.memory_space<vmem>>, vector<1x8x128xf32>
    %6 = vector.shape_cast %5 : vector<1x8x128xf32> to vector<8x128xf32>
    %c0_4 = arith.constant 0 : index
    %c0_5 = arith.constant 0 : index
    %7 = vector.load %arg4[%c0_4, %c0_5] : memref<128x128xf32, #tpu.memory_space<vmem>>, vector<128x128xf32>
    %cst = arith.constant dense<0.000000e+00> : vector<8x128xf32>
    %8 = tpu.matmul %6, %7, %cst {dimension_numbers = #tpu.dot_dimension_numbers<[1], [0], [0], [1], [0, 0, 1, 1], [], []>} : vector<8x128xf32>, vector<128x128xf32>, vector<8x128xf32> -> vector<8x128xf32>
    %9 = arith.addf %3, %8 : vector<8x128xf32>
    %c0_6 = arith.constant 0 : index
    %c0_7 = arith.constant 0 : index
    %10 = vector.load %arg5[%c0_6, %c0_7] : memref<8x128xf32, #tpu.memory_space<vmem>>, vector<8x128xf32>
    tpu.vector_store %arg5[%c0_6, %c0_7], %9 {strides = array<i32>} : memref<8x128xf32, #tpu.memory_space<vmem>>, vector<8x128xf32>,
    return
  }
  func.func @transform_0(%arg0: i32, %arg1: i32, %arg2: i32) -> (i32, i32, i32) {
    %c0_i32 = arith.constant 0 : i32
    %c0_i32_0 = arith.constant 0 : i32
    %c0_i32_1 = arith.constant 0 : i32
    return %c0_i32, %arg0, %c0_i32_0 : i32, i32, i32
  }
  func.func @transform_1(%arg0: i32, %arg1: i32, %arg2: i32) -> (i32, i32) {
    %c0_i32 = arith.constant 0 : i32
    return %arg2, %arg1 : i32, i32
  }
  func.func @transform_2(%arg0: i32, %arg1: i32, %arg2: i32) -> (i32, i32) {
    %c0_i32 = arith.constant 0 : i32
    return %arg0, %arg1 : i32, i32
  }
}

</mosaic_0001>

<bundles_post_ra>
// kernel: anchor_selector_forward.1
= control target key start
LH: loop header
LB: loop body
LE: loop exit
PB: predicated region body
PF: predicated region fallthrough
CT: control target
= control target key end

     0   :  { %v227_v3 = vmov 0.0|0.0   ;;  %vm228_vm0 = vmmov 0   ;;  %v229_v6 = vmov 0.0   ;;  %s309_s0 = inlined_call_operand.vmem [shape: f32[1,8,128], index: 0, kind: input, shape index: {}]   ;;  %s310_s1 = inlined_call_operand.vmem [shape: f32[128,128], index: 1, kind: input, shape index: {}]   ;;  %s311_s2 = inlined_call_operand.hbm [shape: f32[8,128], index: 2, kind: output, shape index: {}]  }
   0x1   :  { %v21_v0 = vld [vmem:[%s310_s1] sm:$0xff]  ;;  %v22_v1 = vld [vmem:[%s310_s1 + $0x8] sm:$0xff]  ;;  %v23_v2 = vld [vmem:[%s310_s1 + $0x10] sm:$0xff]  ;;  %175 = vmatprep.subr.bf16.mxu0 %v227_v3  ;;  %172 = vmatprep.mubr.msk.f32.mxu0 %vm228_vm0, %v229_v6 }
   0x2   :  { %v176_v4 = vpack.c.bf16 %v22_v1, %v21_v0  ;;  %v24_v5 = vld [vmem:[%s310_s1 + $0x18] sm:$0xff]  ;;  %v25_v8 = vld [vmem:[%s310_s1 + $0x20] sm:$0xff]  ;;  %v26_v9 = vld [vmem:[%s310_s1 + $0x28] sm:$0xff] }
   0x3   :  { %v179_v7 = vpack.c.bf16 %v24_v5, %v23_v2 }
   0x4   :  { %177 = vmatpush3.bf16.msra.mxu0 %v176_v4 }
   0x5   :  { %178 = vmatprep.subr.bf16.mxu0 %v227_v3 }
   0x6   :  { %7 = vsyncpa [#allocation3], 0  ;;  %v182_v10 = vpack.c.bf16 %v26_v9, %v25_v8  ;;  %v27_v11 = vld [vmem:[%s310_s1 + $0x30] sm:$0xff]  ;;  %v28_v12 = vld [vmem:[%s310_s1 + $0x38] sm:$0xff]  ;;  %s230_s15 = smov [#allocation2]  }
   0x7   :  { %v185_v13 = vpack.c.bf16 %v28_v12, %v27_v11  ;;  %v29_v14 = vld [vmem:[%s310_s1 + $0x40] sm:$0xff]  ;;  %v30_v15 = vld [vmem:[%s310_s1 + $0x48] sm:$0xff]  ;;  %v31_v17 = vld [vmem:[%s310_s1 + $0x50] sm:$0xff]  ;;  %s115_s16 = sshll.u32 %s230_s15, 4  ;;  %s116_s16 = int_to_ptr.vmem [resolvable:$true] %s115_s16 }
   0x8   :  { %180 = vmatpush3.bf16.msra.mxu0 %v179_v7  ;;  %v188_v16 = vpack.c.bf16 %v30_v15, %v29_v14  ;;  %v32_v18 = vld [vmem:[%s310_s1 + $0x58] sm:$0xff]  ;;  %v33_v20 = vld [vmem:[%s310_s1 + $0x60] sm:$0xff]  ;;  %v34_v21 = vld [vmem:[%s310_s1 + $0x68] sm:$0xff]  ;;  %s203_s17 = scalar_lea.vmem %s116_s16, 128  ;;  %p208_p1 = scmp.lt.s32.totalorder %s116_s16, %s116_s16 }
   0x9   :  { %181 = vmatprep.subr.bf16.mxu0 %v227_v3  ;;  %v191_v19 = vpack.c.bf16 %v32_v18, %v31_v17  ;;  %v194_v22 = vpack.c.bf16 %v34_v21, %v33_v20  ;;  %v35_v23 = vld [vmem:[%s310_s1 + $0x70] sm:$0xff]  ;;  %v36_v24 = vld [vmem:[%s310_s1 + $0x78] sm:$0xff]  ;;  %v20_v26 = vld [vmem:[%s309_s0] sm:$0xff]  ;;  %p204_p0 = scmp.ne.s32.totalorder %s116_s16, %s203_s17  ;;  %p209_p2 = scmp.lt.s32.totalorder %s203_s17, %s203_s17 }
   0xa   :  { %v197_v25 = vpack.c.bf16 %v36_v24, %v35_v23 }
   0xb   :  { %p210_p3 = por %p209_p2, %p208_p1 }
   0xc   :  { %183 = vmatpush3.bf16.msra.mxu0 %v182_v10 }
   0xd   :  { %184 = vmatprep.subr.bf16.mxu0 %v227_v3  ;;  %p211_p4 = pnand %p210_p3, %p204_p0 }
  0x10   :  { %186 = vmatpush3.bf16.msra.mxu0 %v185_v13 }
  0x11   :  { %187 = vmatprep.subr.bf16.mxu0 %v227_v3 }
  0x14   :  { %189 = vmatpush3.bf16.msra.mxu0 %v188_v16 }
  0x15   :  { %190 = vmatprep.subr.bf16.mxu0 %v227_v3 }
  0x18   :  { %192 = vmatpush3.bf16.msra.mxu0 %v191_v19 }
  0x19   :  { %193 = vmatprep.subr.bf16.mxu0 %v227_v3 }
  0x1c   :  { %195 = vmatpush3.bf16.msra.mxu0 %v194_v22 }
  0x1d   :  { %196 = vmatprep.subr.bf16.mxu0 %v227_v3 }
  0x20   :  { %198 = vmatpush3.bf16.msra.mxu0 %v197_v25 }
  0x23   :  { %173 = vmatmul.mubr.f32.vlgmr.msra.gmra.mrb[0].mxu0 %v20_v26 }
  0xf6   :  { %v103_v27 = vpop.f32.mrb[0].mxu0 }
  0xf7   :  { %v174_v28 = vpop.f32.mrb[1].mxu0  ;;  %108 = vst [vmem:[#allocation2] sm:$0xff] %v103_v27 }
  0xf8   :  { %214 = shalt.err (!%p211_p4)
}
  0xf9   :  { %s215_s19 = scalar_lea.hbm %s311_s2, 128 }
  0xfa   :  { %p216_p5 = scmp.ne.s32.totalorder %s311_s2, %s215_s19  ;;  %p219_p6 = scmp.lt.u32.totalorder %s215_s19, %s311_s2 }
  0xfc   :  { %p221_p7 = pnand %p219_p6, %p216_p5 }
  0xfe   :  { %224 = shalt.err (!%p221_p7)
}
  0xff   :  { %118 = dma.vmem_to_hbm [thread:$0]  %s116_s16, 128, %s311_s2, [#allocation3]  }
 0x100   :  { %225 = dma.done.wait [#allocation3], 128  }
 0x101   :  { %226 = vsyncadd [#allocation3], 4294967168 }
 0x102   :  { %122 = vsyncpa [#allocation3], 1 }

</bundles_post_ra>
